<compile_context>
chip_gen: v7x
topology: tpu7x:2x2x1
jax: 0.10.0
libtpu: 0.0.40
codegen_flags: <defaults>
</compile_context>

<pallas_src>
import functools

import jax
import jax.numpy as jnp
from jax.experimental import pallas as pl
from jax.experimental.pallas import tpu as pltpu

BN_EPS = 1e-5
_VMEM_BUDGET = 24 * 1024 * 1024      # double-buffered working-set cap (v7x-safe)
_VMEM_LIMIT = 32 * 1024 * 1024       # explicit scoped-VMEM limit (helps v5e)


def _round_up(v, m):
    return (v + m - 1) // m * m


def _pick_tile(extent, max_tile, unit):
    """Largest tile (multiple of `unit`, <= max_tile) that minimizes padding.

    Returns (tile, padded_extent) with padded_extent % tile == 0.
    """
    p_min = _round_up(extent, unit)
    max_tile = max(unit, min((max_tile // unit) * unit, p_min))
    best_t, best_pad = unit, _round_up(p_min, unit)
    for t in range(unit, max_tile + 1, unit):
        pad = _round_up(p_min, t)
        if pad < best_pad or (pad == best_pad and t > best_t):
            best_t, best_pad = t, pad
    return best_t, best_pad


# -----------------------------------------------------------------------------
# Kernel: one (tm, tn) output tile, accumulated over the K grid axis directly
# in o_ref (f32, K-resident). Epilogue adds the folded bias and applies ReLU.
# -----------------------------------------------------------------------------
def _fc_bias_relu_kernel(x_ref, w_ref, b_ref, o_ref):
    k = pl.program_id(2)

    # x may arrive as f32 (aligned, un-padded fast path) or bf16 (padded path);
    # cast to the weight dtype so the MXU runs in bf16 with f32 accumulation.
    part = jnp.dot(
        x_ref[...].astype(w_ref.dtype),
        w_ref[...],
        preferred_element_type=jnp.float32,
    )

    @pl.when(k == 0)
    def _():
        o_ref[...] = part            # direct assign: no zero-fill pass

    @pl.when(k > 0)
    def _():
        o_ref[...] += part

    @pl.when(k == pl.num_programs(2) - 1)
    def _():
        y = o_ref[...] + b_ref[...]  # (1, tn) bias broadcast, f32
        o_ref[...] = jnp.maximum(y, 0.0).astype(o_ref.dtype)


# -----------------------------------------------------------------------------
# One-time weight preparation (cache the result across forward calls).
# Folds eval-mode BatchNorm1d into the linear weight/bias, casts W' to bf16 and
# pads W'/b' to lane-dense tile multiples.
# -----------------------------------------------------------------------------
def prepare_params(w, b, gamma, beta, running_mean, running_var,
                   *, tn_max=1024, tk_max=1024, compute_dtype=jnp.bfloat16):
    """w: (D_in, H) f32 (transposed from PyTorch's (H, D_in)); vectors: (H,)."""
    D_in, H = w.shape
    tn, Hp = _pick_tile(H, tn_max, unit=128)
    tk, Dp = _pick_tile(D_in, tk_max, unit=128)

    # y = ((x@W + b) - mean) * gamma / sqrt(var + eps) + beta
    #   = x @ (W * scale) + ((b - mean) * scale + beta)
    scale = gamma * jax.lax.rsqrt(running_var + BN_EPS)
    w_fold = (w * scale[None, :]).astype(compute_dtype)
    b_fold = ((b - running_mean) * scale + beta).astype(jnp.float32)

    if (Dp, Hp) != (D_in, H):
        w_p = jnp.zeros((Dp, Hp), compute_dtype).at[:D_in, :H].set(w_fold)
    else:
        w_p = w_fold
    if Hp != H:
        b_p = jnp.zeros((1, Hp), jnp.float32).at[0, :H].set(b_fold)
    else:
        b_p = b_fold[None, :]

    meta = (int(H), int(D_in), int(tn), int(tk))
    return w_p, b_p, meta


# -----------------------------------------------------------------------------
# Forward with pre-prepared (cached) weights.
# -----------------------------------------------------------------------------
@functools.partial(jax.jit, static_argnames=("meta", "tm_max"))
def fc_encoder_forward(x, w_p, b_p, *, meta, tm_max=512):
    """x: (B, D_in) f32; w_p/b_p/meta from prepare_params; returns (B, H) f32."""
    H, D_in, tn, tk = meta
    Dp, Hp = w_p.shape
    B = x.shape[0]
    assert x.shape[1] == D_in

    # M tile: multiple of 8 (sublane), chosen to minimize padded-M work.
    tm, Bp = _pick_tile(B, tm_max, unit=8)

    # v7x megacore: guarantee >=2 blocks along the parallel axes when possible
    # so both TensorCores get work (no-op for the small M*N case).
    if (Bp // tm) * (Hp // tn) < 2 and tn >= 256 and (tn // 2) % 128 == 0:
        tn //= 2

    # Keep the double-buffered working set under the v7x-safe budget.
    # (x budgeted at 4 B/elem to cover the f32 fast path.)
    def _budget(tm_, tn_, tk_):
        return (2 * tm_ * tk_ * 4      # x tiles
                + 2 * tk_ * tn_ * 2    # W' tiles (bf16)
                + 2 * tm_ * tn_ * 4    # output tiles (f32)
                + 2 * tn_ * 4)         # bias
    while _budget(tm, tn, tk) > _VMEM_BUDGET:
        if tk >= 256 and tk % 256 == 0:
            tk //= 2
        elif tn >= 256 and tn % 256 == 0:
            tn //= 2
        elif tm >= 16:
            tm = _round_up(tm // 2, 8)
            Bp = _round_up(B, tm)
        else:
            break

    # Pad/cast x only when required. Aligned shapes stream f32 x directly and
    # cast to bf16 in-kernel (saves an extra HBM read+write pass over x).
    needs_pad = (B != Bp) or (D_in != Dp)
    if needs_pad:
        x_in = jnp.zeros((Bp, Dp), w_p.dtype).at[:B, :D_in].set(
            x.astype(w_p.dtype))
    else:
        x_in = x

    grid = (Bp // tm, Hp // tn, Dp // tk)

    out = pl.pallas_call(
        _fc_bias_relu_kernel,
        out_shape=jax.ShapeDtypeStruct((Bp, Hp), jnp.float32),
        grid_spec=pltpu.PrefetchScalarGridSpec(
            num_scalar_prefetch=0,
            grid=grid,
            in_specs=[
                pl.BlockSpec((tm, tk), lambda i, j, k: (i, k)),   # x tile
                pl.BlockSpec((tk, tn), lambda i, j, k: (k, j)),   # W' tile
                pl.BlockSpec((1, tn), lambda i, j, k: (0, j)),    # b' (N-res.)
            ],
            out_specs=pl.BlockSpec((tm, tn), lambda i, j, k: (i, j)),
        ),
        compiler_params=pltpu.CompilerParams(
            dimension_semantics=("parallel", "parallel", "arbitrary"),
            vmem_limit_bytes=_VMEM_LIMIT,
        ),
    )(x_in, w_p, b_p)

    if (Bp, Hp) != (B, H):
        out = out[:B, :H]
    return out


# -----------------------------------------------------------------------------
# Parameter init / reference
# -----------------------------------------------------------------------------
def init_params(key, input_dims, hidden_dims, init_std=0.01):
    """Deterministic parameter init mirroring FcEncoder.init_weights."""
    (kw,) = jax.random.split(key, 1)
    w_pt = init_std * jax.random.normal(
        kw, (hidden_dims, input_dims), jnp.float32)
    w = w_pt.T                                    # (D_in, H) for the kernel
    b = jnp.zeros((hidden_dims,), jnp.float32)
    gamma = jnp.ones((hidden_dims,), jnp.float32)
    beta = jnp.zeros((hidden_dims,), jnp.float32)
    running_mean = jnp.zeros((hidden_dims,), jnp.float32)
    running_var = jnp.ones((hidden_dims,), jnp.float32)
    return w, b, gamma, beta, running_mean, running_var


def reference_forward(x, w, b, gamma, beta, running_mean, running_var):
    """Plain-JAX f32 reference (unfused) for correctness checking."""
    y = x @ w + b
    y = (y - running_mean) / jnp.sqrt(running_var + BN_EPS) * gamma + beta
    return jnp.maximum(y, 0.0)


if __name__ == "__main__":
    batch, input_dims, hidden_dims = 8, 32, 64

    key = jax.random.PRNGKey(0)
    kx, kp = jax.random.split(key)
    x = jax.random.normal(kx, (batch, input_dims), jnp.float32)
    params = init_params(kp, input_dims, hidden_dims)

    # Prepare (fold BN, cast, pad) ONCE; reuse across forward calls.
    w_p, b_p, meta = prepare_params(*params)
    w_p, b_p = jax.block_until_ready((w_p, b_p))

    out = jax.block_until_ready(fc_encoder_forward(x, w_p, b_p, meta=meta))
    # Second call reuses cached prepared weights + compiled kernel.
    out2 = jax.block_until_ready(fc_encoder_forward(x, w_p, b_p, meta=meta))

    ref = reference_forward(x, *params)

    assert out.shape == (batch, hidden_dims)
    # bf16 MXU inputs with f32 accumulation vs. pure-f32 reference.
    assert jnp.allclose(out, ref, atol=1e-2, rtol=1e-2), "mismatch vs reference"
    assert jnp.array_equal(out, out2), "non-deterministic across calls"

    print("KERNEL_OK")
</pallas_src>

<mosaic_0001>
module attributes {stable_mosaic.version = 11 : i64} {
  func.func @_fc_bias_relu_kernel(%arg0: i32, %arg1: i32, %arg2: i32, %arg3: memref<8x128xbf16, #tpu.memory_space<vmem>>, %arg4: memref<128x128xbf16, #tpu.memory_space<vmem>>, %arg5: memref<1x128xf32, #tpu.memory_space<vmem>>, %arg6: memref<8x128xf32, #tpu.memory_space<vmem>>) attributes {dimension_semantics = [#tpu.dimension_semantics<parallel>, #tpu.dimension_semantics<parallel>, #tpu.dimension_semantics<arbitrary>], iteration_bounds = array<i64: 1, 1, 1>, scalar_prefetch = 0 : i64, scratch_operands = 0 : i64, tpu.core_type = #tpu.core_type<tc>, window_params = [{transform_indices = @transform_0, window_bounds = array<i64: 8, 128>}, {transform_indices = @transform_1, window_bounds = array<i64: 128, 128>}, {transform_indices = @transform_2, window_bounds = array<i64: 1, 128>}, {transform_indices = @transform_3, window_bounds = array<i64: 8, 128>}]} {
    %c0 = arith.constant 0 : index
    %c0_0 = arith.constant 0 : index
    %0 = vector.load %arg3[%c0, %c0_0] : memref<8x128xbf16, #tpu.memory_space<vmem>>, vector<8x128xbf16>
    %c0_1 = arith.constant 0 : index
    %c0_2 = arith.constant 0 : index
    %1 = vector.load %arg4[%c0_1, %c0_2] : memref<128x128xbf16, #tpu.memory_space<vmem>>, vector<128x128xbf16>
    %cst = arith.constant dense<0.000000e+00> : vector<8x128xf32>
    %2 = tpu.matmul %0, %1, %cst {dimension_numbers = #tpu.dot_dimension_numbers<[1], [0], [0], [1], [0, 0, 1, 1], [], []>} : vector<8x128xbf16>, vector<128x128xbf16>, vector<8x128xf32> -> vector<8x128xf32>
    %c0_i32 = arith.constant 0 : i32
    %3 = arith.cmpi eq, %arg2, %c0_i32 : i32
    %4 = arith.extui %3 : i1 to i32
    %c0_i32_3 = arith.constant 0 : i32
    %5 = arith.cmpi ne, %4, %c0_i32_3 : i32
    scf.if %5 {
      %c0_8 = arith.constant 0 : index
      %c0_9 = arith.constant 0 : index
      %12 = vector.load %arg6[%c0_8, %c0_9] : memref<8x128xf32, #tpu.memory_space<vmem>>, vector<8x128xf32>
      tpu.vector_store %arg6[%c0_8, %c0_9], %2 {strides = array<i32>} : memref<8x128xf32, #tpu.memory_space<vmem>>, vector<8x128xf32>,
    } else {
    }
    %c0_i32_4 = arith.constant 0 : i32
    %6 = arith.cmpi sgt, %arg2, %c0_i32_4 : i32
    %7 = arith.extui %6 : i1 to i32
    %c0_i32_5 = arith.constant 0 : i32
    %8 = arith.cmpi ne, %7, %c0_i32_5 : i32
    scf.if %8 {
      %c0_8 = arith.constant 0 : index
      %c0_9 = arith.constant 0 : index
      %12 = vector.load %arg6[%c0_8, %c0_9] : memref<8x128xf32, #tpu.memory_space<vmem>>, vector<8x128xf32>
      %13 = arith.addf %12, %2 : vector<8x128xf32>
      %c0_10 = arith.constant 0 : index
      %c0_11 = arith.constant 0 : index
      %14 = vector.load %arg6[%c0_10, %c0_11] : memref<8x128xf32, #tpu.memory_space<vmem>>, vector<8x128xf32>
      tpu.vector_store %arg6[%c0_10, %c0_11], %13 {strides = array<i32>} : memref<8x128xf32, #tpu.memory_space<vmem>>, vector<8x128xf32>,
    } else {
    }
    %c0_i32_6 = arith.constant 0 : i32
    %9 = arith.cmpi eq, %arg2, %c0_i32_6 : i32
    %10 = arith.extui %9 : i1 to i32
    %c0_i32_7 = arith.constant 0 : i32
    %11 = arith.cmpi ne, %10, %c0_i32_7 : i32
    scf.if %11 {
      %c0_8 = arith.constant 0 : index
      %c0_9 = arith.constant 0 : index
      %12 = vector.load %arg6[%c0_8, %c0_9] : memref<8x128xf32, #tpu.memory_space<vmem>>, vector<8x128xf32>
      %c0_10 = arith.constant 0 : index
      %c0_11 = arith.constant 0 : index
      %13 = vector.load %arg5[%c0_10, %c0_11] : memref<1x128xf32, #tpu.memory_space<vmem>>, vector<1x128xf32>
      %14 = vector.broadcast %13 : vector<1x128xf32> to vector<8x128xf32>
      %15 = arith.addf %12, %14 : vector<8x128xf32>
      %cst_12 = arith.constant 0.000000e+00 : f32
      %16 = vector.broadcast %cst_12 : f32 to vector<8x128xf32>
      %17 = arith.maximumf %15, %16 : vector<8x128xf32>
      %c0_13 = arith.constant 0 : index
      %c0_14 = arith.constant 0 : index
      %18 = vector.load %arg6[%c0_13, %c0_14] : memref<8x128xf32, #tpu.memory_space<vmem>>, vector<8x128xf32>
      tpu.vector_store %arg6[%c0_13, %c0_14], %17 {strides = array<i32>} : memref<8x128xf32, #tpu.memory_space<vmem>>, vector<8x128xf32>,
    } else {
    }
    return
  }
  func.func @transform_0(%arg0: i32, %arg1: i32, %arg2: i32) -> (i32, i32) {
    %c0_i32 = arith.constant 0 : i32
    return %arg0, %arg2 : i32, i32
  }
  func.func @transform_1(%arg0: i32, %arg1: i32, %arg2: i32) -> (i32, i32) {
    %c0_i32 = arith.constant 0 : i32
    return %arg2, %arg1 : i32, i32
  }
  func.func @transform_2(%arg0: i32, %arg1: i32, %arg2: i32) -> (i32, i32) {
    %c0_i32 = arith.constant 0 : i32
    %c0_i32_0 = arith.constant 0 : i32
    return %c0_i32, %arg1 : i32, i32
  }
  func.func @transform_3(%arg0: i32, %arg1: i32, %arg2: i32) -> (i32, i32) {
    %c0_i32 = arith.constant 0 : i32
    return %arg0, %arg1 : i32, i32
  }
}

</mosaic_0001>

<bundles_post_ra>
// kernel: fc_encoder_forward.1
= control target key start
LH: loop header
LB: loop body
LE: loop exit
PB: predicated region body
PF: predicated region fallthrough
CT: control target
= control target key end

     0   :  { %8 = vsyncpa [#allocation3], 0  ;;  %s332_s0 = inlined_call_operand.vmem [shape: bf16[8,128], index: 0, kind: input, shape index: {}]   ;;  %s333_s1 = inlined_call_operand.hbm [shape: bf16[128,128], index: 1, kind: input, shape index: {}]   ;;  %s334_s2 = inlined_call_operand.vmem [shape: f32[1,128], index: 2, kind: input, shape index: {}]   ;;  %s335_s3 = inlined_call_operand.hbm [shape: f32[8,128], index: 3, kind: output, shape index: {}]  }
   0x1   :  { %9 = vsyncpa [#allocation4], 0  ;;  %s276_s12 = smov [#allocation2]   ;;  %s228_s16 = scalar_lea.hbm %s333_s1, 1024 }
   0x2   :  { %s17_s13 = sshll.u32 %s276_s12, 4  ;;  %p229_p0 = scmp.ne.s32.totalorder %s333_s1, %s228_s16  ;;  %s18_s13 = int_to_ptr.vmem [resolvable:$true] %s17_s13 }
   0x3   :  { %p232_p1 = scmp.lt.u32.totalorder %s228_s16, %s333_s1 }
   0x5   :  { %p234_p2 = pnand %p232_p1, %p229_p0 }
   0x7   :  { %237 = shalt.err (!%p234_p2)
}
   0x8   :  { %s238_s21 = scalar_lea.vmem %s18_s13, 1024  ;;  %p243_p4 = scmp.lt.s32.totalorder %s18_s13, %s18_s13 }
   0x9   :  { %p239_p3 = scmp.ne.s32.totalorder %s18_s13, %s238_s21  ;;  %p244_p5 = scmp.lt.s32.totalorder %s238_s21, %s238_s21 }
   0xb   :  { %p245_p6 = por %p244_p5, %p243_p4 }
   0xd   :  { %p246_p7 = pnand %p245_p6, %p239_p3 }
   0xf   :  { %249 = shalt.err (!%p246_p7)
}
  0x10   :  { %s277_s22 = smov 64   ;;  %s278_s23 = smov 4  }
  0x11   :  { %23 = dma.hbm_to_vmem [thread:$0]  %s333_s1, 1024, %s18_s13, [#allocation3], %s277_s22, %s277_s22, %s278_s23  }
  0x12   :  { %272 = dma.done.wait [#allocation3], 1024  }
  0x13   :  { %273 = vsyncadd [#allocation3], 4294966272  ;;  %v279_v0 = vmov 0.0   ;;  %vm280_vm0 = vmmov 0   ;;  %v220_v1 = vld [vmem:[#allocation2] sm:$0xff]   ;;  %v221_v2 = vld [vmem:[#allocation2 + $0x8] sm:$0xff]  }
  0x14   :  { %194 = vmatprep.subr.bf16.mxu0 %v279_v0  ;;  %210 = vmatprep.mubr.msk.bf16.mxu0 %vm280_vm0, %v279_v0  ;;  %v222_v3 = vld [vmem:[#allocation2 + $0x10] sm:$0xff]   ;;  %v223_v4 = vld [vmem:[#allocation2 + $0x18] sm:$0xff]   ;;  %v224_v5 = vld [vmem:[#allocation2 + $0x20] sm:$0xff]   ;;  %s281_s29 = smov [#allocation5]  }
  0x15   :  { %195 = vmatpush3.bf16.msra.mxu0 %v220_v1  ;;  %v225_v6 = vld [vmem:[#allocation2 + $0x28] sm:$0xff]   ;;  %v226_v7 = vld [vmem:[#allocation2 + $0x30] sm:$0xff]   ;;  %v227_v8 = vld [vmem:[#allocation2 + $0x38] sm:$0xff]   ;;  %s167_s30 = sshll.u32 %s281_s29, 4  ;;  %s168_s30 = int_to_ptr.vmem [resolvable:$true] %s167_s30 }
  0x16   :  { %196 = vmatprep.subr.bf16.mxu0 %v279_v0  ;;  %v30_v9 = vld [vmem:[%s332_s0] sm:$0xf]  ;;  %s250_s4 = scalar_lea.vmem %s168_s30, 128  ;;  %p255_p9 = scmp.lt.s32.totalorder %s168_s30, %s168_s30 }
  0x17   :  { %v184_v10 = vld [vmem:[%s334_s2] ss:$0 sm:$0xff]  ;;  %p251_p8 = scmp.ne.s32.totalorder %s168_s30, %s250_s4  ;;  %p256_p10 = scmp.lt.s32.totalorder %s250_s4, %s250_s4 }
  0x19   :  { %197 = vmatpush3.bf16.msra.mxu0 %v221_v2  ;;  %p257_p11 = por %p256_p10, %p255_p9 }
  0x1a   :  { %198 = vmatprep.subr.bf16.mxu0 %v279_v0 }
  0x1b   :  { %p258_p12 = pnand %p257_p11, %p251_p8 }
  0x1d   :  { %199 = vmatpush3.bf16.msra.mxu0 %v222_v3 }
  0x1e   :  { %200 = vmatprep.subr.bf16.mxu0 %v279_v0 }
  0x21   :  { %201 = vmatpush3.bf16.msra.mxu0 %v223_v4 }
  0x22   :  { %202 = vmatprep.subr.bf16.mxu0 %v279_v0 }
  0x25   :  { %203 = vmatpush3.bf16.msra.mxu0 %v224_v5 }
  0x26   :  { %204 = vmatprep.subr.bf16.mxu0 %v279_v0 }
  0x29   :  { %205 = vmatpush3.bf16.msra.mxu0 %v225_v6 }
  0x2a   :  { %206 = vmatprep.subr.bf16.mxu0 %v279_v0 }
  0x2d   :  { %207 = vmatpush3.bf16.msra.mxu0 %v226_v7 }
  0x2e   :  { %208 = vmatprep.subr.bf16.mxu0 %v279_v0 }
  0x31   :  { %209 = vmatpush3.bf16.msra.mxu0 %v227_v8 }
  0x34   :  { %211 = vmatmul.mubr.bf16.vlgmr.msra.gmra.mrb[0].mxu0 %v30_v9 }
 0x107   :  { %v129_v11 = vpop.f32.mrb[0].mxu0 }
 0x108   :  { %v212_v12 = vpop.f32.mrb[1].mxu0  ;;  %v158_v13 = vadd.f32 %v184_v10, %v129_v11 }
 0x109   :  { %v132_v14 = vpop.f32.mrb[2].mxu0 }
 0x10a   :  { %v213_v15 = vpop.f32.mrb[3].mxu0  ;;  %v159_v16 = vmax.f32 %v158_v13, 0.0 }
 0x10c   :  { %160 = vst [vmem:[#allocation5] sm:$0xff] %v159_v16 }
 0x10d   :  { %261 = shalt.err (!%p258_p12)
}
 0x10e   :  { %s262_s2 = scalar_lea.hbm %s335_s3, 128 }
 0x10f   :  { %p263_p13 = scmp.ne.s32.totalorder %s335_s3, %s262_s2  ;;  %p266_p0 = scmp.lt.u32.totalorder %s262_s2, %s335_s3 }
 0x111   :  { %p268_p1 = pnand %p266_p0, %p263_p13 }
 0x113   :  { %271 = shalt.err (!%p268_p1)
}
 0x114   :  { %170 = dma.vmem_to_hbm [thread:$0]  %s168_s30, 128, %s335_s3, [#allocation4]  }
 0x115   :  { %274 = dma.done.wait [#allocation4], 128  }
 0x116   :  { %275 = vsyncadd [#allocation4], 4294967168 }
 0x117   :  { %174 = vsyncpa [#allocation3], 1 }
 0x118   :  { %175 = vsyncpa [#allocation4], 1 }

</bundles_post_ra>
